<compile_context>
chip_gen: v6e
topology: v6e:2x2x1
jax: 0.10.0
libtpu: 0.0.40
codegen_flags: <defaults>
</compile_context>

<pallas_src>
import jax
import jax.numpy as jnp
from jax.experimental import pallas as pl
from jax.experimental.pallas import tpu as pltpu


def _round_up(x, m):
    return ((x + m - 1) // m) * m


def _choose_vocab_tile(vocab, desired):
    """Largest multiple-of-128 divisor of vocab that is <= desired (else full vocab)."""
    desired = max(128, min(desired, vocab))
    t = (desired // 128) * 128
    while t >= 128:
        if vocab % t == 0:
            return t
        t -= 128
    return vocab


# --------------------------------------------------------------------------
# Kernel 1: fused LM-head + cross-entropy with online log-sum-exp over
#           vocab tiles. grid = (token_chunks [parallel], vocab_tiles [arbitrary]).
# --------------------------------------------------------------------------
def _fused_ce_kernel(h_ref, lab_ref, w_ref, loss_ref, cnt_ref,
                     m_scr, l_scr, ll_scr):
    j = pl.program_id(1)                     # vocab tile index (reduction axis)

    @pl.when(j == 0)
    def _():
        m_scr[...] = jnp.full(m_scr.shape, -jnp.inf, jnp.float32)
        l_scr[...] = jnp.zeros(l_scr.shape, jnp.float32)
        ll_scr[...] = jnp.zeros(ll_scr.shape, jnp.float32)

    h = h_ref[...]                           # (tn, H)  model dtype (no upcast)
    w = w_ref[...]                           # (tv, H)  model dtype (no upcast)
    lab = lab_ref[0]                         # (1, tn)  int32, lane-dense

    # logits for this vocab tile in (tv, tn) orientation: per-token state is
    # lane-dense, reductions over vocab are along the sublane axis.
    logits = jax.lax.dot_general(
        w, h, (((1,), (1,)), ((), ())), preferred_element_type=jnp.float32
    )                                         # (tv, tn) f32

    # --- online log-sum-exp over vocab tiles ---
    m_old = m_scr[...]                                           # (1, tn)
    m_new = jnp.maximum(m_old, jnp.max(logits, axis=0, keepdims=True))
    l_scr[...] = l_scr[...] * jnp.exp(m_old - m_new) + jnp.sum(
        jnp.exp(logits - m_new), axis=0, keepdims=True)
    m_scr[...] = m_new

    # --- accumulate the label logit (each label hits exactly one vocab tile) ---
    row = jax.lax.broadcasted_iota(jnp.int32, logits.shape, 0) + j * w_ref.shape[0]
    ll_scr[...] += jnp.sum(jnp.where(row == lab, logits, 0.0),
                           axis=0, keepdims=True)

    @pl.when(j == pl.num_programs(1) - 1)
    def _():
        lse = m_scr[...] + jnp.log(l_scr[...])                   # (1, tn)
        valid = lab != -100                                       # (1, tn)
        # CrossEntropyLoss(reduction='sum') over this token chunk
        loss_ref[0] = jnp.sum(jnp.where(valid, lse - ll_scr[...], 0.0),
                              keepdims=True)
        cnt_ref[0] = jnp.sum(valid.astype(jnp.float32), keepdims=True)


def narrow_processing_loss(hidden_states, labels, lm_head_weight, mini_s=16,
                           *, tn=None, tv=1024, vmem_limit_bytes=None):
    """Pallas equivalent of narrow_processing() when labels is not None."""
    b, s, hdim = hidden_states.shape
    vocab = lm_head_weight.shape[0]

    # Shift on the labels (tiny) instead of slicing the activations: token t
    # predicts labels[t+1]; the last token of every row gets ignore_index.
    shifted = jnp.concatenate(
        [labels[:, 1:], jnp.full((b, 1), -100, labels.dtype)], axis=1
    ).astype(jnp.int32)                                   # (B, S)

    hs = hidden_states.reshape(b * s, hdim)               # free reshape, no copy
    lab = shifted.reshape(b * s)

    # token tile: mirror the original mini-sequence chunk size (B * S/mini_s)
    if tn is None:
        tn = b * max(1, s // mini_s)
    n = b * s
    tn = max(8, _round_up(min(tn, n), 8))
    n_pad = _round_up(n, tn)
    if n_pad != n:
        hs = jnp.pad(hs, ((0, n_pad - n), (0, 0)))
        lab = jnp.pad(lab, ((0, n_pad - n),), constant_values=-100)
    n_chunks = n_pad // tn

    tv = _choose_vocab_tile(vocab, tv)
    n_vtiles = vocab // tv

    cp_kwargs = dict(dimension_semantics=("parallel", "arbitrary"))
    if vmem_limit_bytes is not None:
        # For production shapes (e.g. H=4096, tv>=1024 bf16) raise this
        # toward ~48 MiB on v7x / ~100 MiB on v6e/v5e.
        cp_kwargs["vmem_limit_bytes"] = vmem_limit_bytes

    loss_parts, cnt_parts = pl.pallas_call(
        _fused_ce_kernel,
        out_shape=(
            jax.ShapeDtypeStruct((n_chunks, 1, 1), jnp.float32),
            jax.ShapeDtypeStruct((n_chunks, 1, 1), jnp.float32),
        ),
        grid_spec=pltpu.PrefetchScalarGridSpec(
            num_scalar_prefetch=0,
            grid=(n_chunks, n_vtiles),
            in_specs=[
                pl.BlockSpec((tn, hdim), lambda t, j: (t, 0)),     # hidden chunk
                pl.BlockSpec((1, 1, tn), lambda t, j: (t, 0, 0)),  # labels (lane-dense)
                pl.BlockSpec((tv, hdim), lambda t, j: (j, 0)),     # weight vocab tile
            ],
            out_specs=[
                pl.BlockSpec((1, 1, 1), lambda t, j: (t, 0, 0)),   # partial loss sum
                pl.BlockSpec((1, 1, 1), lambda t, j: (t, 0, 0)),   # partial valid count
            ],
            scratch_shapes=[
                pltpu.VMEM((1, tn), jnp.float32),   # running max
                pltpu.VMEM((1, tn), jnp.float32),   # running sum-exp
                pltpu.VMEM((1, tn), jnp.float32),   # label logit
            ],
        ),
        compiler_params=pltpu.CompilerParams(**cp_kwargs),
    )(hs, lab.reshape(n_chunks, 1, tn), lm_head_weight)

    total_loss = jnp.sum(loss_parts)
    total_cnt = jnp.sum(cnt_parts)
    # guard against every label being ignore_index
    return jnp.where(total_cnt > 0, total_loss / total_cnt, jnp.float32(0.0))


# --------------------------------------------------------------------------
# Kernel 2: labels=None path -> logits of the last position only,
#           vocab-tiled (weight streamed once, lane-dense >=128 output tiles)
# --------------------------------------------------------------------------
def _lm_head_kernel(h_ref, w_ref, o_ref):
    o_ref[...] = jax.lax.dot_general(
        h_ref[...], w_ref[...], (((1,), (1,)), ((), ())),
        preferred_element_type=jnp.float32,
    )


def narrow_processing_logits(hidden_states, lm_head_weight,
                             *, tv=1024, vmem_limit_bytes=None):
    """Pallas equivalent of narrow_processing() when labels is None."""
    b, s, hdim = hidden_states.shape
    vocab = lm_head_weight.shape[0]
    tv = _choose_vocab_tile(vocab, tv)

    cp_kwargs = dict(dimension_semantics=("parallel",))
    if vmem_limit_bytes is not None:
        cp_kwargs["vmem_limit_bytes"] = vmem_limit_bytes

    last = hidden_states[:, -1, :]            # (B, H)
    logits = pl.pallas_call(
        _lm_head_kernel,
        out_shape=jax.ShapeDtypeStruct((b, vocab), jnp.float32),
        grid_spec=pltpu.PrefetchScalarGridSpec(
            num_scalar_prefetch=0,
            grid=(vocab // tv,),
            in_specs=[
                pl.BlockSpec((b, hdim), lambda j: (0, 0)),
                pl.BlockSpec((tv, hdim), lambda j: (j, 0)),
            ],
            out_specs=pl.BlockSpec((b, tv), lambda j: (0, j)),
        ),
        compiler_params=pltpu.CompilerParams(**cp_kwargs),
    )(last, lm_head_weight)
    return logits.reshape(b, 1, vocab)        # matches lm_head(h[..., -1:, :]).float()


# --------------------------------------------------------------------------
# Wrapper mirroring LlamaForCausalLMWarpper.forward's head logic
# --------------------------------------------------------------------------
def llama_wrapper_forward(hidden_states, labels, lm_head_weight, mini_s=16,
                          *, tn=None, tv=1024, vmem_limit_bytes=None):
    if labels is None:
        return narrow_processing_logits(
            hidden_states, lm_head_weight, tv=tv,
            vmem_limit_bytes=vmem_limit_bytes), None
    return None, narrow_processing_loss(
        hidden_states, labels, lm_head_weight, mini_s,
        tn=tn, tv=tv, vmem_limit_bytes=vmem_limit_bytes)


# --------------------------------------------------------------------------
# Pure-JAX reference (for validation)
# --------------------------------------------------------------------------
def _ref_loss(hidden_states, labels, w):
    hdim = hidden_states.shape[-1]
    hs = hidden_states[:, :-1, :].reshape(-1, hdim)
    lab = labels[:, 1:].reshape(-1)
    logits = (hs @ w.T).astype(jnp.float32)
    lse = jax.scipy.special.logsumexp(logits, axis=-1)
    safe = jnp.where(lab == -100, 0, lab)
    lab_logit = jnp.take_along_axis(logits, safe[:, None], axis=1)[:, 0]
    valid = lab != -100
    return jnp.sum(jnp.where(valid, lse - lab_logit, 0.0)) / jnp.sum(valid)


if __name__ == "__main__":
    import numpy as np

    B, S, H, V = 2, 16, 128, 256
    MINI_S = 4          # -> token tile tn = B * S/MINI_S = 8 (4 parallel chunks)
    TV = 128            # -> 2 vocab tiles: exercises the online log-sum-exp

    key = jax.random.PRNGKey(0)
    k1, k2, k3 = jax.random.split(key, 3)

    hidden_states = jax.random.normal(k1, (B, S, H), dtype=jnp.float32) * 0.5
    lm_head_weight = jax.random.normal(k2, (V, H), dtype=jnp.float32) * 0.05
    labels = jax.random.randint(k3, (B, S), 0, V, dtype=jnp.int32)
    # sprinkle some ignored positions (ignore_index = -100)
    labels = labels.at[:, :2].set(-100)
    labels = labels.at[1, 7].set(-100)

    # loss path (labels given)
    _, loss = llama_wrapper_forward(hidden_states, labels, lm_head_weight,
                                    MINI_S, tv=TV)
    loss = jax.block_until_ready(loss)
    ref = jax.block_until_ready(_ref_loss(hidden_states, labels, lm_head_weight))
    assert np.allclose(np.asarray(loss), np.asarray(ref), rtol=1e-3, atol=1e-3), (
        float(loss), float(ref))

    # logits path (labels is None)
    logits, _ = llama_wrapper_forward(hidden_states, None, lm_head_weight,
                                      MINI_S, tv=TV)
    logits = jax.block_until_ready(logits)
    ref_logits = (hidden_states[:, -1:, :] @ lm_head_weight.T).astype(jnp.float32)
    assert logits.shape == (B, 1, V)
    assert np.allclose(np.asarray(logits), np.asarray(ref_logits),
                       rtol=1e-3, atol=1e-3)

    print("KERNEL_OK")
</pallas_src>

<mosaic_0001>
module attributes {stable_mosaic.version = 11 : i64} {
  func.func @_fused_ce_kernel(%arg0: i32, %arg1: i32, %arg2: memref<8x128xf32, #tpu.memory_space<vmem>>, %arg3: memref<1x1x8xi32, #tpu.memory_space<vmem>>, %arg4: memref<128x128xf32, #tpu.memory_space<vmem>>, %arg5: memref<1x1x1xf32, #tpu.memory_space<vmem>>, %arg6: memref<1x1x1xf32, #tpu.memory_space<vmem>>, %arg7: memref<1x8xf32, #tpu.memory_space<vmem>>, %arg8: memref<1x8xf32, #tpu.memory_space<vmem>>, %arg9: memref<1x8xf32, #tpu.memory_space<vmem>>) attributes {dimension_semantics = [#tpu.dimension_semantics<parallel>, #tpu.dimension_semantics<arbitrary>], iteration_bounds = array<i64: 4, 2>, scalar_prefetch = 0 : i64, scratch_operands = 3 : i64, tpu.core_type = #tpu.core_type<tc>, window_params = [{transform_indices = @transform_0, window_bounds = array<i64: 8, 128>}, {transform_indices = @transform_1, window_bounds = array<i64: 1, 1, 8>}, {transform_indices = @transform_2, window_bounds = array<i64: 128, 128>}, {transform_indices = @transform_3, window_bounds = array<i64: 1, 1, 1>}, {transform_indices = @transform_4, window_bounds = array<i64: 1, 1, 1>}]} {
    %c0_i32 = arith.constant 0 : i32
    %0 = arith.cmpi eq, %arg1, %c0_i32 : i32
    %1 = arith.extui %0 : i1 to i32
    %c0_i32_0 = arith.constant 0 : i32
    %2 = arith.cmpi ne, %1, %c0_i32_0 : i32
    scf.if %2 {
      %cst_24 = arith.constant 0xFF800000 : f32
      %40 = vector.broadcast %cst_24 : f32 to vector<1x8xf32>
      %c0_25 = arith.constant 0 : index
      %c0_26 = arith.constant 0 : index
      %41 = vector.load %arg7[%c0_25, %c0_26] : memref<1x8xf32, #tpu.memory_space<vmem>>, vector<1x8xf32>
      tpu.vector_store %arg7[%c0_25, %c0_26], %40 {strides = array<i32>} : memref<1x8xf32, #tpu.memory_space<vmem>>, vector<1x8xf32>,
      %cst_27 = arith.constant 0.000000e+00 : f32
      %42 = vector.broadcast %cst_27 : f32 to vector<1x8xf32>
      %c0_28 = arith.constant 0 : index
      %c0_29 = arith.constant 0 : index
      %43 = vector.load %arg8[%c0_28, %c0_29] : memref<1x8xf32, #tpu.memory_space<vmem>>, vector<1x8xf32>
      tpu.vector_store %arg8[%c0_28, %c0_29], %42 {strides = array<i32>} : memref<1x8xf32, #tpu.memory_space<vmem>>, vector<1x8xf32>,
      %cst_30 = arith.constant 0.000000e+00 : f32
      %44 = vector.broadcast %cst_30 : f32 to vector<1x8xf32>
      %c0_31 = arith.constant 0 : index
      %c0_32 = arith.constant 0 : index
      %45 = vector.load %arg9[%c0_31, %c0_32] : memref<1x8xf32, #tpu.memory_space<vmem>>, vector<1x8xf32>
      tpu.vector_store %arg9[%c0_31, %c0_32], %44 {strides = array<i32>} : memref<1x8xf32, #tpu.memory_space<vmem>>, vector<1x8xf32>,
    } else {
    }
    %c0 = arith.constant 0 : index
    %c0_1 = arith.constant 0 : index
    %3 = vector.load %arg2[%c0, %c0_1] : memref<8x128xf32, #tpu.memory_space<vmem>>, vector<8x128xf32>
    %c0_2 = arith.constant 0 : index
    %c0_3 = arith.constant 0 : index
    %4 = vector.load %arg4[%c0_2, %c0_3] : memref<128x128xf32, #tpu.memory_space<vmem>>, vector<128x128xf32>
    %c0_4 = arith.constant 0 : index
    %c0_5 = arith.constant 0 : index
    %c0_6 = arith.constant 0 : index
    %5 = vector.load %arg3[%c0_4, %c0_5, %c0_6] : memref<1x1x8xi32, #tpu.memory_space<vmem>>, vector<1x1x8xi32>
    %6 = vector.shape_cast %5 : vector<1x1x8xi32> to vector<1x8xi32>
    %cst = arith.constant dense<0.000000e+00> : vector<128x8xf32>
    %7 = tpu.matmul %4, %3, %cst {dimension_numbers = #tpu.dot_dimension_numbers<[1], [1], [0], [0], [0, 0, 1, 0], [], []>} : vector<128x128xf32>, vector<8x128xf32>, vector<128x8xf32> -> vector<128x8xf32>
    %c0_7 = arith.constant 0 : index
    %c0_8 = arith.constant 0 : index
    %8 = vector.load %arg7[%c0_7, %c0_8] : memref<1x8xf32, #tpu.memory_space<vmem>>, vector<1x8xf32>
    %cst_9 = arith.constant dense<0xFF800000> : vector<8xf32>
    %9 = vector.multi_reduction <maximumf>, %7, %cst_9 [0] : vector<128x8xf32> to vector<8xf32>
    %10 = vector.shape_cast %9 : vector<8xf32> to vector<1x8xf32>
    %11 = arith.maximumf %8, %10 : vector<1x8xf32>
    %c0_10 = arith.constant 0 : index
    %c0_11 = arith.constant 0 : index
    %12 = vector.load %arg8[%c0_10, %c0_11] : memref<1x8xf32, #tpu.memory_space<vmem>>, vector<1x8xf32>
    %13 = arith.subf %8, %11 : vector<1x8xf32>
    %14 = math.exp %13 : vector<1x8xf32>
    %15 = arith.mulf %12, %14 : vector<1x8xf32>
    %16 = vector.broadcast %11 : vector<1x8xf32> to vector<128x8xf32>
    %17 = arith.subf %7, %16 : vector<128x8xf32>
    %18 = math.exp %17 : vector<128x8xf32>
    %cst_12 = arith.constant dense<0.000000e+00> : vector<8xf32>
    %19 = vector.multi_reduction <add>, %18, %cst_12 [0] : vector<128x8xf32> to vector<8xf32>
    %20 = vector.shape_cast %19 : vector<8xf32> to vector<1x8xf32>
    %21 = arith.addf %15, %20 : vector<1x8xf32>
    %c0_13 = arith.constant 0 : index
    %c0_14 = arith.constant 0 : index
    %22 = vector.load %arg8[%c0_13, %c0_14] : memref<1x8xf32, #tpu.memory_space<vmem>>, vector<1x8xf32>
    tpu.vector_store %arg8[%c0_13, %c0_14], %21 {strides = array<i32>} : memref<1x8xf32, #tpu.memory_space<vmem>>, vector<1x8xf32>,
    %c0_15 = arith.constant 0 : index
    %c0_16 = arith.constant 0 : index
    %23 = vector.load %arg7[%c0_15, %c0_16] : memref<1x8xf32, #tpu.memory_space<vmem>>, vector<1x8xf32>
    tpu.vector_store %arg7[%c0_15, %c0_16], %11 {strides = array<i32>} : memref<1x8xf32, #tpu.memory_space<vmem>>, vector<1x8xf32>,
    %24 = tpu.iota {dimensions = array<i32: 0>} : vector<128x8xi32>
    %c128_i32 = arith.constant 128 : i32
    %25 = arith.muli %arg1, %c128_i32 : i32
    %26 = vector.broadcast %25 : i32 to vector<128x8xi32>
    %27 = arith.addi %24, %26 : vector<128x8xi32>
    %c0_17 = arith.constant 0 : index
    %c0_18 = arith.constant 0 : index
    %28 = vector.load %arg9[%c0_17, %c0_18] : memref<1x8xf32, #tpu.memory_space<vmem>>, vector<1x8xf32>
    %29 = vector.broadcast %6 : vector<1x8xi32> to vector<128x8xi32>
    %30 = arith.cmpi eq, %27, %29 : vector<128x8xi32>
    %cst_19 = arith.constant 0.000000e+00 : f32
    %31 = vector.broadcast %cst_19 : f32 to vector<128x8xf32>
    %32 = arith.select %30, %7, %31 : vector<128x8xi1>, vector<128x8xf32>
    %cst_20 = arith.constant dense<0.000000e+00> : vector<8xf32>
    %33 = vector.multi_reduction <add>, %32, %cst_20 [0] : vector<128x8xf32> to vector<8xf32>
    %34 = vector.shape_cast %33 : vector<8xf32> to vector<1x8xf32>
    %35 = arith.addf %28, %34 : vector<1x8xf32>
    %c0_21 = arith.constant 0 : index
    %c0_22 = arith.constant 0 : index
    %36 = vector.load %arg9[%c0_21, %c0_22] : memref<1x8xf32, #tpu.memory_space<vmem>>, vector<1x8xf32>
    tpu.vector_store %arg9[%c0_21, %c0_22], %35 {strides = array<i32>} : memref<1x8xf32, #tpu.memory_space<vmem>>, vector<1x8xf32>,
    %c1_i32 = arith.constant 1 : i32
    %37 = arith.cmpi eq, %arg1, %c1_i32 : i32
    %38 = arith.extui %37 : i1 to i32
    %c0_i32_23 = arith.constant 0 : i32
    %39 = arith.cmpi ne, %38, %c0_i32_23 : i32
    scf.if %39 {
      %c0_24 = arith.constant 0 : index
      %c0_25 = arith.constant 0 : index
      %40 = vector.load %arg7[%c0_24, %c0_25] : memref<1x8xf32, #tpu.memory_space<vmem>>, vector<1x8xf32>
      %c0_26 = arith.constant 0 : index
      %c0_27 = arith.constant 0 : index
      %41 = vector.load %arg8[%c0_26, %c0_27] : memref<1x8xf32, #tpu.memory_space<vmem>>, vector<1x8xf32>
      %42 = math.log %41 : vector<1x8xf32>
      %43 = arith.addf %40, %42 : vector<1x8xf32>
      %c-100_i32 = arith.constant -100 : i32
      %44 = vector.broadcast %c-100_i32 : i32 to vector<1x8xi32>
      %45 = arith.cmpi ne, %6, %44 : vector<1x8xi32>
      %c0_28 = arith.constant 0 : index
      %c0_29 = arith.constant 0 : index
      %46 = vector.load %arg9[%c0_28, %c0_29] : memref<1x8xf32, #tpu.memory_space<vmem>>, vector<1x8xf32>
      %47 = arith.subf %43, %46 : vector<1x8xf32>
      %cst_30 = arith.constant 0.000000e+00 : f32
      %48 = vector.broadcast %cst_30 : f32 to vector<1x8xf32>
      %49 = arith.select %45, %47, %48 : vector<1x8xi1>, vector<1x8xf32>
      %50 = vector.shape_cast %49 : vector<1x8xf32> to vector<1x1x8xf32>
      %cst_31 = arith.constant dense<0.000000e+00> : vector<1xf32>
      %51 = vector.multi_reduction <add>, %50, %cst_31 [1, 2] : vector<1x1x8xf32> to vector<1xf32>
      %52 = vector.shape_cast %51 : vector<1xf32> to vector<1x1x1xf32>
      %53 = vector.extract %52[0, 0, 0] : f32 from vector<1x1x1xf32>
      %54 = vector.broadcast %53 : f32 to vector<1x1xf32>
      %c0_32 = arith.constant 0 : index
      %c0_33 = arith.constant 0 : index
      %c0_34 = arith.constant 0 : index
      %55 = vector.load %arg5[%c0_32, %c0_33, %c0_34] : memref<1x1x1xf32, #tpu.memory_space<vmem>>, vector<1x1x1xf32>
      %56 = vector.shape_cast %55 : vector<1x1x1xf32> to vector<1x1xf32>
      %57 = vector.shape_cast %54 : vector<1x1xf32> to vector<1x1x1xf32>
      tpu.vector_store %arg5[%c0_32, %c0_33, %c0_34], %57 {strides = array<i32>} : memref<1x1x1xf32, #tpu.memory_space<vmem>>, vector<1x1x1xf32>,
      %58 = arith.extui %45 : vector<1x8xi1> to vector<1x8xi32>
      %59 = arith.sitofp %58 : vector<1x8xi32> to vector<1x8xf32>
      %60 = vector.shape_cast %59 : vector<1x8xf32> to vector<1x1x8xf32>
      %cst_35 = arith.constant dense<0.000000e+00> : vector<1xf32>
      %61 = vector.multi_reduction <add>, %60, %cst_35 [1, 2] : vector<1x1x8xf32> to vector<1xf32>
      %62 = vector.shape_cast %61 : vector<1xf32> to vector<1x1x1xf32>
      %63 = vector.extract %62[0, 0, 0] : f32 from vector<1x1x1xf32>
      %64 = vector.broadcast %63 : f32 to vector<1x1xf32>
      %c0_36 = arith.constant 0 : index
      %c0_37 = arith.constant 0 : index
      %c0_38 = arith.constant 0 : index
      %65 = vector.load %arg6[%c0_36, %c0_37, %c0_38] : memref<1x1x1xf32, #tpu.memory_space<vmem>>, vector<1x1x1xf32>
      %66 = vector.shape_cast %65 : vector<1x1x1xf32> to vector<1x1xf32>
      %67 = vector.shape_cast %64 : vector<1x1xf32> to vector<1x1x1xf32>
      tpu.vector_store %arg6[%c0_36, %c0_37, %c0_38], %67 {strides = array<i32>} : memref<1x1x1xf32, #tpu.memory_space<vmem>>, vector<1x1x1xf32>,
    } else {
    }
    return
  }
  func.func @transform_0(%arg0: i32, %arg1: i32) -> (i32, i32) {
    %c0_i32 = arith.constant 0 : i32
    %c0_i32_0 = arith.constant 0 : i32
    return %arg0, %c0_i32 : i32, i32
  }
  func.func @transform_1(%arg0: i32, %arg1: i32) -> (i32, i32, i32) {
    %c0_i32 = arith.constant 0 : i32
    %c0_i32_0 = arith.constant 0 : i32
    %c0_i32_1 = arith.constant 0 : i32
    return %arg0, %c0_i32, %c0_i32_0 : i32, i32, i32
  }
  func.func @transform_2(%arg0: i32, %arg1: i32) -> (i32, i32) {
    %c0_i32 = arith.constant 0 : i32
    %c0_i32_0 = arith.constant 0 : i32
    return %arg1, %c0_i32 : i32, i32
  }
  func.func @transform_3(%arg0: i32, %arg1: i32) -> (i32, i32, i32) {
    %c0_i32 = arith.constant 0 : i32
    %c0_i32_0 = arith.constant 0 : i32
    %c0_i32_1 = arith.constant 0 : i32
    return %arg0, %c0_i32, %c0_i32_0 : i32, i32, i32
  }
  func.func @transform_4(%arg0: i32, %arg1: i32) -> (i32, i32, i32) {
    %c0_i32 = arith.constant 0 : i32
    %c0_i32_0 = arith.constant 0 : i32
    %c0_i32_1 = arith.constant 0 : i32
    return %arg0, %c0_i32, %c0_i32_0 : i32, i32, i32
  }
}

</mosaic_0001>

<bundles_post_ra>
// kernel: tpu_custom_call.1
= control target key start
LH: loop header
LB: loop body
LE: loop exit
PB: predicated region body
PF: predicated region fallthrough
CT: control target
= control target key end

     0   :  { %s1859_s0 = inlined_call_operand.hbm [shape: f32[32,128], index: 0, kind: input, shape index: {}]   ;;  %s1860_s1 = inlined_call_operand.hbm [shape: s32[4,1,8], index: 1, kind: input, shape index: {}]   ;;  %s1861_s2 = inlined_call_operand.hbm [shape: f32[256,128], index: 2, kind: input, shape index: {}]   ;;  %s1862_s3 = inlined_call_operand.vmem [shape: f32[4,1,1], index: 3, kind: output, shape index: {0}]   ;;  %s1863_s4 = inlined_call_operand.vmem [shape: f32[4,1,1], index: 4, kind: output, shape index: {1}]  }
   0x1   :  { %1869 = sst [smem:[#allocation19_spill]] %s1860_s1 }
   0x2   :  { %10 = vsyncpa [#allocation6], 0 }
   0x3   :  { %12 = vsyncpa [#allocation6 + $0x1], 0 }
   0x4   :  { %13 = vsyncpa [#allocation8], 0 }
   0x5   :  { %15 = vsyncpa [#allocation8 + $0x1], 0  ;;  %s1333_s15 = smov 0   ;;  %s1335_s16 = smov 0  }
   0x6   :  { %s1337_s17 = smov 0   ;;  %s1339_s18 = smov 0  }
   0x7   :  { %s1341_s19 = smov 0   ;;  %s1343_s20 = smov 0  }
   0x8   :  { %s1345_s21 = smov 0   ;;  %s1347_s22 = smov 0  }
   0x9   :  { %s1349_s23 = smov 0   ;;  %s1351_s24 = smov 0  }
   0xa   :  { %s1353_s25 = smov 0  }
   0xb LB: > { %1870 = sst [smem:[#allocation13_spill]] %s1278_s20  ;;  %s1864_s26 = sadd.s32 4294967295, %s1298_s25   ;;  %s1298_s25 = sphi %s1353_s25, %s21_s25   ;;  %s1294_s24 = sphi %s1351_s24, %s1900_s24   ;;  %s1290_s23 = sphi %s1349_s23, %s1899_s23   ;;  %s1286_s22 = sphi %s1347_s22, %s1898_s22   ;;  %s1282_s21 = sphi %s1345_s21, %s1897_s21   ;;  %s1278_s20 = sphi %s1343_s20, %s1889_s20   ;;  %s1274_s19 = sphi %s1341_s19, %s1896_s19   ;;  %s1270_s18 = sphi %s1339_s18, %s1895_s18   ;;  %s1266_s17 = sphi %s1337_s17, %s1894_s17   ;;  %s1262_s16 = sphi %s1335_s16, %s1893_s16   ;;  %s1258_s15 = sphi %s1333_s15, %s1892_s15  }
   0xc   : > { %1871 = sst [smem:[#allocation14_spill]] %s1282_s21  ;;  %s30_s27 = sadd.s32 1, %s1290_s23 }
   0xd   : > { %p31_p0 = scmp.ge.s32.totalorder %s30_s27, 2  ;;  %s33_s28 = sadd.s32 1, %s1294_s24 }
   0xe   : > { %s40_s29 = sadd.s32 1, %s1278_s20  ;;  %p47_p1 = scmp.ne.s32.totalorder %s1278_s20, %s1274_s19 }
   0xf   : > { %s1902_s27 = smov (%p31_p0, %s30_s27), 0  ;;  %s1904_s28 = smov (!%p31_p0, %s33_s28), %s1294_s24 }
  0x10   : > { %1872 = sst [smem:[#allocation15_spill]] %s1902_s27  ;;  %p48_p2 = scmp.eq.s32.totalorder %s1298_s25, 0 }
  0x11   : > { %p53_p3 = scmp.ne.s32.totalorder %s1274_s19, %s1270_s18  ;;  %p35_p4 = scmp.ge.s32.totalorder %s1904_s28, 4 }
  0x12   : > { %p1399_p5 = scmp.eq.s32.totalorder %s1864_s26, 0  ;;  %p1405_p6 = por %p48_p2, %p47_p1 }
  0x13   : > { %s89_s6 = ssub.s32 %s1290_s23, %s1902_s27  ;;  %s1906_s28 = smov (%p35_p4, %s1904_s28), 0 }
  0x14   : > { %1875 = sst [smem:[#allocation16_spill]] %s1906_s28  ;;  %p1415_p7 = por %p1399_p5, %p53_p3 }
  0x15   : > { %p90_p8 = scmp.eq.s32.totalorder %s89_s6, 0  ;;  %s37_s8 = ssub.s32 %s1294_s24, %s1906_s28 }
  0x16   : > { %s92_s9 = sadd.s32 1, %s1266_s17  ;;  %p38_p9 = scmp.eq.s32.totalorder %s37_s8, 0 }
  0x17   : > { %p99_p10 = scmp.ne.s32.totalorder %s1266_s17, %s1262_s16  ;;  %p105_p12 = scmp.ne.s32.totalorder %s1262_s16, %s1258_s15 }
  0x18   : > { %s1425_s10 = scalar_select %p90_p8, %s1266_s17, %s92_s9  }
  0x19   : > { %s1428_s11 = scalar_select %p38_p9, %s1278_s20, %s40_s29  }
  0x1a   : > { %1877 = sst [smem:[#allocation17_spill]] %s1425_s10  ;;  %p101_p11 = por %p99_p10, %p48_p2 }
  0x1b   : > { %1878 = sst [smem:[#allocation18_spill]] %s1428_s11  ;;  %p986_p13 = scmp.lt.s32.totalorder %s1298_s25, 8 }
  0x1c   : > { %p1437_p0 = por %p105_p12, %p1399_p5  ;;  %s1442_s13 = sand.u32 1, %s1278_s20  }
  0x1d   : > { %p1446_p1 = pnand %p986_p13, %p1405_p6  ;;  %s199_s18 = sand.u32 1, %s1298_s25  }
  0x1e   : > { %s907_s29 = sshll.u32 %s1294_s24, 4  ;;  %s1881_s1 = sld [smem:[#allocation19_spill]] }
  0x1f   : > { %s202_s8 = scalar_lea.vmem [#allocation7], %s1442_s13  ;;  %p1456_p2 = pnand %p986_p13, %p101_p11 }
  0x20   : > { %s209_s9 = sshll.u32 %s202_s8, 4  ;;  %s1460_s5 = scalar_lea.sflag [#allocation8], %s199_s18  ;;  %s210_s9 = int_to_ptr.vmem [resolvable:$true] %s209_s9 }
  0x21   : > { %p1118_p3 = pneg %p1446_p1  ;;  %s1129_s28 = scalar_lea.vmem %s210_s9, 16 }
  0x22   : > { %p1130_p4 = scmp.ne.s32.totalorder %s210_s9, %s1129_s28  ;;  %s1300_s27 = smov [#allocation7]  }
  0x23   : > { %s1134_s6 = sshll.u32 %s1300_s27, 4  ;;  %s1135_s6 = int_to_ptr.vmem [resolvable:$false] %s1134_s6 }
  0x24   : > { %s207_s30 = scalar_lea.hbm %s1881_s1, %s907_s29  ;;  %p1132_p5 = pnand %p1130_p4, %p1118_p3 }
  0x25   : > { %s1136_s29 = scalar_lea.vmem %s1135_s6, 32  ;;  %p1137_p8 = scmp.lt.s32.totalorder %s210_s9, %s1135_s6 }
  0x26   : > { %p1133_p6 = pneg %p1132_p5  ;;  %p1138_p9 = scmp.lt.s32.totalorder %s1136_s29, %s1129_s28 }
  0x28   : > { %p1139_p10 = por %p1138_p9, %p1137_p8 }
  0x2a   : > { %p1140_p11 = pnand %p1139_p10, %p1133_p6 }
  0x2c   : > { %1143 = shalt.err (!%p1140_p11)
}
  0x2d   : > { %982 = dma.hbm_to_vmem [thread:$0]  (!%p1446_p1), %s207_s30, 16, %s210_s9, %s1460_s5  }
  0x2e   : > { %p911_p12 = scmp.ge.s32.totalorder %s1298_s25, 1  ;;  %p235_p13 = scmp.lt.s32.totalorder %s1298_s25, 9 }
  0x2f   : > { %s905_s28 = sshll.u32 %s1442_s13, 3  ;;  %s906_s18 = sshll.u32 %s1294_s24, 7 }
  0x30   : > { %p1472_p4 = pnand %p911_p12, %p235_p13  ;;  %s190_s6 = scalar_lea.hbm %s1859_s0, %s906_s18 }
  0x31   : > { %s185_s29 = scalar_lea.vmem [#allocation5], %s905_s28  ;;  %s218_s11 = sand.u32 1, %s1266_s17  }
  0x32   : > { %s192_s1 = sshll.u32 %s185_s29, 4  ;;  %s182_s20 = scalar_lea.sflag [#allocation6], %s1442_s13  ;;  %s193_s1 = int_to_ptr.vmem [resolvable:$true] %s192_s1 }
  0x33   : > { %s1157_s10 = scalar_lea.vmem %s193_s1, 128  ;;  %s1301_s30 = smov [#allocation5]  }
  0x34   : > { %p1158_p5 = scmp.ne.s32.totalorder %s193_s1, %s1157_s10  ;;  %s1162_s9 = sshll.u32 %s1301_s30, 4  ;;  %s1163_s9 = int_to_ptr.vmem [resolvable:$false] %s1162_s9 }
  0x35   : > { %s1164_s21 = scalar_lea.vmem %s1163_s9, 256  ;;  %p1165_p9 = scmp.lt.s32.totalorder %s193_s1, %s1163_s9 }
  0x36   : > { %p1160_p6 = pnand %p1158_p5, %p1118_p3  ;;  %p1166_p10 = scmp.lt.s32.totalorder %s1164_s21, %s1157_s10 }
  0x38   : > { %p1161_p8 = pneg %p1160_p6  ;;  %p1167_p11 = por %p1166_p10, %p1165_p9 }
  0x3a   : > { %p1168_p12 = pnand %p1167_p11, %p1161_p8 }
  0x3c   : > { %1171 = shalt.err (!%p1168_p12)
}
  0x3d   : > { %979 = dma.hbm_to_vmem [thread:$0]  (!%p1446_p1), %s190_s6, 128, %s193_s1, %s182_s20  }
  0x3e   : > { %s908_s13 = sshll.u32 %s218_s11, 7  ;;  %s920_s28 = sshll.u32 %s1290_s23, 11 }
  0x3f   : > { %s226_s8 = scalar_lea.hbm %s1861_s2, %s920_s28  ;;  %s220_s29 = scalar_lea.vmem [#allocation9], %s908_s13 }
  0x40   : > { %s227_s30 = sshll.u32 %s220_s29, 4  ;;  %p1174_p3 = pneg %p1456_p2  ;;  %s228_s30 = int_to_ptr.vmem [resolvable:$true] %s227_s30 }
  0x41   : > { %s1185_s21 = scalar_lea.vmem %s228_s30, 2048  ;;  %s1302_s10 = smov [#allocation9]  }
  0x42   : > { %p1186_p13 = scmp.ne.s32.totalorder %s228_s30, %s1185_s21  ;;  %s1190_s14 = sshll.u32 %s1302_s10, 4  ;;  %s1191_s14 = int_to_ptr.vmem [resolvable:$false] %s1190_s14 }
  0x43   : > { %s1192_s9 = scalar_lea.vmem %s1191_s14, 4096  ;;  %p1193_p1 = scmp.lt.s32.totalorder %s228_s30, %s1191_s14 }
  0x44   : > { %p1188_p5 = pnand %p1186_p13, %p1174_p3  ;;  %p1194_p8 = scmp.lt.s32.totalorder %s1192_s9, %s1185_s21 }
  0x46   : > { %p1189_p6 = pneg %p1188_p5  ;;  %p1195_p9 = por %p1194_p8, %p1193_p1 }
  0x48   : > { %p1196_p10 = pnand %p1195_p9, %p1189_p6 }
  0x4a   : > { %1199 = shalt.err (!%p1196_p10)
}
  0x4b   : > { %s1303_s1 = smov 128   ;;  %s1304_s20 = smov 8  }
  0x4c   : > { %985 = dma.hbm_to_vmem [thread:$0]  (!%p1456_p2), %s226_s8, 2048, %s228_s30, %s1460_s5, %s1303_s1, %s1303_s1, %s1304_s20  }
  0x4d   : > { %239 = sbr.rel (%p1472_p4) target bundleno = 646 (0x286), region = 32  ;;  %s1500_s11 = sand.u32 (!%p1472_p4), 1, %s1274_s19  }
  0x4e   : > { %s912_s6 = sshll.u32 (!%p1472_p4), %s1500_s11, 3  ;;  %s242_s13 = scalar_lea.sflag (!%p1472_p4), [#allocation6], %s1500_s11 }
  0x4f   : > { %s245_s28 = scalar_lea.vmem (!%p1472_p4), [#allocation5], %s912_s6 }
  0x52   : > { %1245 = dma.done.wait (%p1415_p7), %s242_s13, 128  }
  0x53   : > { %1247 = vsyncadd (%p1415_p7), %s242_s13, 4294967168  ;;  %s1884_s26 = sadd.s32 4294967295, %s1298_s25   ;;  %s253_s18 = scalar_lea.vmem [#allocation7], %s1500_s11 }
  0x54   : > { %s250_s5 = sand.u32 1, %s1884_s26  }
  0x55   : > { %s251_s27 = scalar_lea.sflag [#allocation8], %s250_s5 }
  0x56   : > { %1249 = dma.done.wait (%p1415_p7), %s251_s27, 16  }
  0x57   : > { %1251 = vsyncadd (%p1415_p7), %s251_s27, 4294967280  ;;  %s260_s15 = sand.u32 1, %s1262_s16  }
  0x58   : > { %s913_s8 = sshll.u32 %s260_s15, 7 }
  0x59   : > { %s1516_s29 = scalar_lea.vmem [#allocation9], %s913_s8 }
  0x5a   : > { %1253 = dma.done.wait (%p1437_p0), %s251_s27, 2048  }
  0x5b   : > { %1255 = vsyncadd (%p1437_p0), %s251_s27, 4294965248  ;;  %p298_p2 = scmp.lt.s32.totalorder %s1286_s22, 3  ;;  %s1885_s1 = sld [smem:[#allocation14_spill]] }
  0x5d   : > { %s1908_s22 = smov (!%p298_p2, %s1286_s22), 3 }
  0x5e   : > { %s300_s21 = scalar_lea.vmem %s1862_s3, %s1908_s22  ;;  %s303_s9 = scalar_lea.vmem %s1863_s4, %s1908_s22 }
  0x61   : > { %p914_p7 = scmp.ne.s32.totalorder %s1885_s1, 0 }
  0x63   : > { %307 = sbr.rel (%p914_p7) target bundleno = 107 (0x6b), region = 48 }
  0x68   : > { %vm308_vm0 = vcmask 57344   ;;  %v1305_v0 = vmov -inf   ;;  %v1306_v1 = vmov 0.0  }
  0x69   : > { %309 = vst.msk [vmem:[#allocation2] sm:$0x1] %vm308_vm0, %v1305_v0  ;;  %310 = vst.msk [vmem:[#allocation3] sm:$0x1] %vm308_vm0, %v1306_v1 }
  0x6a   : > { %311 = vst.msk [vmem:[#allocation4] sm:$0x1] %vm308_vm0, %v1306_v1 }
  0x6b PF: > { %v312_v2 = vld [vmem:[%s245_s28] sm:$0xff]  ;;  %v313_v3 = vld [vmem:[%s1516_s29] sm:$0xff]  ;;  %s1886_s12 = sld [smem:[#allocation14_spill]]  ;;  %v521_v19 = vlaneseq  ;;  %v1558_v23 = vld [vmem:[%s253_s18] sm:$0x1]  ;;  %vm476_vm3 = vcmask 64512  }
  0x6c   : > { %938 = vmatprep.subr.mxu0 %v312_v2  ;;  %964 = vmatprep.subr.mxu1 %v312_v2  ;;  %v321_v4 = vld [vmem:[%s1516_s29 + $0x40] sm:$0xff]  ;;  %v314_v5 = vld [vmem:[%s1516_s29 + $0x8] sm:$0xff]  ;;  %v315_v7 = vld [vmem:[%s1516_s29 + $0x10] sm:$0xff] }
  0x6d   : > { %939 = vmatpush3.xpose.msra.mxu0 %v312_v2  ;;  %965 = vmatpush3.xpose.msra.mxu1 %v312_v2  ;;  %v322_v6 = vld [vmem:[%s1516_s29 + $0x48] sm:$0xff]  ;;  %v323_v8 = vld [vmem:[%s1516_s29 + $0x50] sm:$0xff]  ;;  %v316_v9 = vld [vmem:[%s1516_s29 + $0x18] sm:$0xff]  ;;  %v1551_v20 = vshrl.u32 %v521_v19, 7 }
  0x6e   : > { %940 = vmatprep.mubr.f32.mxu0 %v313_v3  ;;  %952 = vmatprep.mubr.f32.mxu1 %v321_v4  ;;  %v324_v10 = vld [vmem:[%s1516_s29 + $0x58] sm:$0xff]  ;;  %v317_v11 = vld [vmem:[%s1516_s29 + $0x20] sm:$0xff]  ;;  %v318_v13 = vld [vmem:[%s1516_s29 + $0x28] sm:$0xff] }
  0x6f   : > { %v325_v12 = vld [vmem:[%s1516_s29 + $0x60] sm:$0xff]  ;;  %v326_v14 = vld [vmem:[%s1516_s29 + $0x68] sm:$0xff]  ;;  %v319_v15 = vld [vmem:[%s1516_s29 + $0x30] sm:$0xff]  ;;  %v523_v21 = vsub.s32 0, %v1551_v20  ;;  %v617_v22 = vadd.s32 8, %v1551_v20  ;;  %v619_v25 = vadd.s32 24, %v1551_v20 }
  0x70   : > { %941 = vmatmul.mubr.f32.vlgmr.msra.gmra.mxu0 %v314_v5  ;;  %953 = vmatmul.mubr.f32.vlgmr.msra.gmra.mxu1 %v322_v6  ;;  %v327_v16 = vld [vmem:[%s1516_s29 + $0x70] sm:$0xff]  ;;  %v320_v17 = vld [vmem:[%s1516_s29 + $0x38] sm:$0xff]  ;;  %v618_v26 = vadd.s32 16, %v1551_v20  ;;  %v625_v30 = vadd.s32 72, %v1551_v20  ;;  %v624_v31 = vadd.s32 64, %v1551_v20  ;;  %v621_v33 = vadd.s32 40, %v1551_v20 }
  0x71   : > { %943 = vmatprep.mubr.f32.mxu0 %v315_v7  ;;  %955 = vmatprep.mubr.f32.mxu1 %v323_v8  ;;  %v328_v18 = vld [vmem:[%s1516_s29 + $0x78] sm:$0xff]  ;;  %s915_s20 = sshll.u32 %s1886_s12, 7  ;;  %v1568_v28 = vrot.slane %v1558_v23, %v523_v21  ;;  %v620_v34 = vadd.s32 32, %v1551_v20  ;;  %v623_v38 = vadd.s32 56, %v1551_v20  ;;  %v622_v39 = vadd.s32 48, %v1551_v20  ;;  %p916_p0 = scmp.ne.s32.totalorder %s1886_s12, 1 }
  0x72   : > { %v1560_v24 = vstv %s915_s20  ;;  %v627_v42 = vadd.s32 88, %v1551_v20  ;;  %v626_v46 = vadd.s32 80, %v1551_v20  ;;  %v629_v50 = vadd.s32 104, %v1551_v20 }
  0x73   : > { %v635_v27 = vadd.s32 %v1560_v24, %v617_v22  ;;  %v634_v29 = vadd.s32 %v1560_v24, %v1551_v20  ;;  %v637_v32 = vadd.s32 %v1560_v24, %v619_v25  ;;  %v636_v35 = vadd.s32 %v1560_v24, %v618_v26 }
  0x74   : > { %944 = vmatmul.mubr.f32.gmra.mxu0 %v316_v9  ;;  %956 = vmatmul.mubr.f32.gmra.mxu1 %v324_v10  ;;  %v1587_v40 = vadd.s32 %v1560_v24, %v625_v30  ;;  %v642_v41 = vadd.s32 %v1560_v24, %v624_v31  ;;  %v639_v45 = vadd.s32 %v1560_v24, %v621_v33  ;;  %v628_v55 = vadd.s32 96, %v1551_v20 }
  0x75   : > { %946 = vmatprep.mubr.f32.mxu0 %v317_v11  ;;  %958 = vmatprep.mubr.f32.mxu1 %v325_v12  ;;  %vm656_vm1 = vcmp.eq.s32.totalorder %v635_v27, %v1568_v28  ;;  %vm655_vm2 = vcmp.eq.s32.totalorder %v634_v29, %v1568_v28  ;;  %vm658_vm4 = vcmp.eq.s32.totalorder %v637_v32, %v1568_v28 }
  0x76   : > { %v638_v47 = vadd.s32 %v1560_v24, %v620_v34  ;;  %vm657_vm5 = vcmp.eq.s32.totalorder %v636_v35, %v1568_v28  ;;  %v641_v54 = vadd.s32 %v1560_v24, %v623_v38  ;;  %v640_v56 = vadd.s32 %v1560_v24, %v622_v39 }
  0x77   : > { %vm663_vm6 = vcmp.eq.s32.totalorder %v642_v41, %v1568_v28  ;;  %v1613_v57 = vadd.s32 %v1560_v24, %v627_v42  ;;  %vm660_vm7 = vcmp.eq.s32.totalorder %v639_v45, %v1568_v28  ;;  %v1622_v61 = vadd.s32 %v1560_v24, %v626_v46 }
  0x78   : > { %947 = vmatmul.mubr.f32.gmra.mxu0 %v318_v13  ;;  %959 = vmatmul.mubr.f32.gmra.mxu1 %v326_v14  ;;  %vm659_vm8 = vcmp.eq.s32.totalorder %v638_v47, %v1568_v28  ;;  %v1632_v1 = vadd.s32 %v1560_v24, %v629_v50  ;;  %vm664_vm9 = vcmp.eq.s32.totalorder %v1587_v40, %v1568_v28 }
  0x79   : > { %949 = vmatprep.mubr.f32.mxu0 %v319_v15  ;;  %961 = vmatprep.mubr.f32.mxu1 %v327_v16  ;;  %vm662_vm10 = vcmp.eq.s32.totalorder %v641_v54, %v1568_v28  ;;  %v1643_v5 = vadd.s32 %v1560_v24, %v628_v55  ;;  %vm661_vm11 = vcmp.eq.s32.totalorder %v640_v56, %v1568_v28 }
  0x7a   : > { %vm665_vm12 = vcmp.eq.s32.totalorder %v1622_v61, %v1568_v28  ;;  %vm666_vm13 = vcmp.eq.s32.totalorder %v1613_v57, %v1568_v28  ;;  %vm668_vm15 = vcmp.eq.s32.totalorder %v1632_v1, %v1568_v28 }
  0x7b   : > { %vm667_vm14 = vcmp.eq.s32.totalorder %v1643_v5, %v1568_v28 }
  0x7c   : > { %950 = vmatmul.mubr.f32.gmra.mxu0 %v320_v17  ;;  %962 = vmatmul.mubr.f32.gmra.mxu1 %v328_v18 }
 0x130   : > { %v1578_v36 = vpop.f32.mrf.mxu0  ;;  %v1582_v37 = vpop.f32.mrf.mxu1 }
 0x131   : > { %v672_v48 = vsel %vm656_vm1, %v1578_v36, 0.0  ;;  %v478_v6 = vsel %vm476_vm3, %v1578_v36, -inf  ;;  %v491_v7 = vsel %vm476_vm3, %v1582_v37, -inf }
 0x132   : > { %v1591_v43 = vpop.f32.mrf.mxu0  ;;  %v1594_v44 = vpop.f32.mrf.mxu1  ;;  %v688_v58 = vsel %vm476_vm3, %v672_v48, 0.0 }
 0x133   : > { %v671_v49 = vsel %vm655_vm2, %v1591_v43, 0.0  ;;  %v477_v10 = vsel %vm476_vm3, %v1591_v43, -inf  ;;  %v489_v12 = vsel %vm476_vm3, %v1594_v44, -inf  ;;  %v679_v13 = vsel %vm663_vm6, %v1594_v44, 0.0 }
 0x134   : > { %v687_v51 = vsel %vm476_vm3, %v671_v49, 0.0  ;;  %v1604_v52 = vpop.f32.mrf.mxu0  ;;  %v1606_v53 = vpop.f32.mrf.mxu1  ;;  %vm612_vm2 = vcmask 57344  }
 0x135   : > { %v689_v62 = vadd.f32 %v688_v58, %v687_v51  ;;  %v674_v63 = vsel %vm658_vm4, %v1604_v52, 0.0  ;;  %v480_v22 = vsel %vm476_vm3, %v1604_v52, -inf  ;;  %v495_v32 = vsel %vm476_vm3, %v1606_v53, -inf }
 0x136   : > { %v1616_v59 = vpop.f32.mrf.mxu0  ;;  %v1619_v60 = vpop.f32.mrf.mxu1  ;;  %v692_v11 = vsel %vm476_vm3, %v674_v63, 0.0 }
 0x137   : > { %v673_v0 = vsel %vm657_vm5, %v1616_v59, 0.0  ;;  %v479_v31 = vsel %vm476_vm3, %v1616_v59, -inf  ;;  %v493_v38 = vsel %vm476_vm3, %v1619_v60, -inf }
 0x138   : > { %v690_v2 = vsel %vm476_vm3, %v673_v0, 0.0  ;;  %v1637_v3 = vpop.f32.mrf.mxu0  ;;  %v1639_v4 = vpop.f32.mrf.mxu1 }
 0x139   : > { %v691_v8 = vadd.f32 %v690_v2, %v689_v62  ;;  %v483_v9 = vsel %vm476_vm3, %v1637_v3, -inf  ;;  %v676_v16 = vsel %vm660_vm7, %v1637_v3, 0.0  ;;  %v499_v62 = vsel %vm476_vm3, %v1639_v4, -inf }
 0x13a   : > { %v1662_v14 = vpop.f32.mrf.mxu0  ;;  %v1664_v15 = vpop.f32.mrf.mxu1  ;;  %v484_v25 = vmax.f32 %v478_v6, %v483_v9  ;;  %v696_v35 = vsel %vm476_vm3, %v676_v16, 0.0  ;;  %v684_v57 = vsel %vm668_vm15, %v1639_v4, 0.0 }
 0x13b   : > { %v481_v17 = vsel %vm476_vm3, %v1662_v14, -inf  ;;  %v675_v18 = vsel %vm659_vm8, %v1662_v14, 0.0  ;;  %v693_v19 = vadd.f32 %v692_v11, %v691_v8  ;;  %v497_v54 = vsel %vm476_vm3, %v1664_v15, -inf }
 0x13c   : > { %v482_v26 = vmax.f32 %v477_v10, %v481_v17  ;;  %v694_v27 = vsel %vm476_vm3, %v675_v18, 0.0  ;;  %v1679_v29 = vpop.f32.mrf.mxu0  ;;  %v1681_v30 = vpop.f32.mrf.mxu1  ;;  %v492_v49 = vmax.f32 %v484_v25, %v491_v7  ;;  %v630_v7 = vadd.s32 112, %v1551_v20 }
 0x13d   : > { %v695_v33 = vadd.f32 %v694_v27, %v693_v19  ;;  %v487_v34 = vsel %vm476_vm3, %v1679_v29, -inf  ;;  %v678_v45 = vsel %vm662_vm10, %v1679_v29, 0.0  ;;  %v503_v0 = vsel %vm476_vm3, %v1681_v30, -inf }
 0x13e   : > { %v488_v39 = vmax.f32 %v480_v22, %v487_v34  ;;  %v490_v41 = vmax.f32 %v482_v26, %v489_v12  ;;  %v1692_v42 = vpop.f32.mrf.mxu0  ;;  %v1703_v58 = vpop.f32.mrf.mxu1  ;;  %v700_v56 = vsel %vm476_vm3, %v678_v45, 0.0  ;;  %v680_v8 = vsel %vm664_vm9, %v1582_v37, 0.0 }
 0x13f   : > { %v485_v46 = vsel %vm476_vm3, %v1692_v42, -inf  ;;  %v677_v47 = vsel %vm661_vm11, %v1692_v42, 0.0  ;;  %v697_v48 = vadd.f32 %v696_v35, %v695_v33  ;;  %v631_v10 = vadd.s32 120, %v1551_v20 }
 0x140   : > { %v486_v50 = vmax.f32 %v479_v31, %v485_v46  ;;  %v698_v51 = vsel %vm476_vm3, %v677_v47, 0.0  ;;  %v496_v55 = vmax.f32 %v488_v39, %v495_v32  ;;  %v498_v2 = vmax.f32 %v490_v41, %v497_v54 }
 0x141   : > { %v699_v63 = vadd.f32 %v698_v51, %v697_v48  ;;  %v501_v11 = vsel %vm476_vm3, %v1703_v58, -inf  ;;  %v702_v12 = vsel %vm476_vm3, %v679_v13, 0.0  ;;  %v500_v16 = vmax.f32 %v492_v49, %v499_v62 }
 0x142   : > { %v494_v6 = vmax.f32 %v486_v50, %v493_v38  ;;  %v504_v17 = vmax.f32 %v496_v55, %v503_v0  ;;  %v681_v19 = vsel %vm665_vm12, %v1619_v60, 0.0  ;;  %v704_v22 = vsel %vm476_vm3, %v680_v8, 0.0 }
 0x143   : > { %v701_v9 = vadd.f32 %v700_v56, %v699_v63  ;;  %v505_v25 = vmax.f32 %v498_v2, %v500_v16  ;;  %v648_v27 = vadd.s32 %v1560_v24, %v630_v7  ;;  %v682_v13 = vsel %vm666_vm13, %v1606_v53, 0.0  ;;  %v1748_v63 = vld [vmem:[#allocation2] sm:$0x1] }
 0x144   : > { %v502_v18 = vmax.f32 %v494_v6, %v501_v11  ;;  %v706_v32 = vsel %vm476_vm3, %v681_v19, 0.0  ;;  %v649_v61 = vadd.s32 %v1560_v24, %v631_v10  ;;  %v683_v33 = vsel %vm667_vm14, %v1664_v15, 0.0 }
 0x145   : > { %v703_v40 = vadd.f32 %v702_v12, %v701_v9  ;;  %v708_v35 = vsel %vm476_vm3, %v682_v13, 0.0  ;;  %vm669_vm0 = vcmp.eq.s32.totalorder %v648_v27, %v1568_v28  ;;  %v710_v41 = vsel %vm476_vm3, %v683_v33, 0.0 }
 0x146   : > { %v506_v26 = vmax.f32 %v502_v18, %v504_v17  ;;  %vm670_vm1 = vcmp.eq.s32.totalorder %v649_v61, %v1568_v28  ;;  %v685_v1 = vsel %vm669_vm0, %v1703_v58, 0.0  ;;  %v712_v46 = vsel %vm476_vm3, %v684_v57, 0.0 }
 0x147   : > { %v705_v31 = vadd.f32 %v704_v22, %v703_v40  ;;  %v686_v48 = vsel %vm670_vm1, %v1681_v30, 0.0  ;;  %v714_v51 = vsel %vm476_vm3, %v685_v1, 0.0  ;;  %v650_v22 = vld [vmem:[#allocation4] sm:$0x1] }
 0x148   : > { %v507_v5 = vmax.f32 %v505_v25, %v506_v26  ;;  %v716_v62 = vsel %vm476_vm3, %v686_v48, 0.0 }
 0x149   : > { %v707_v34 = vadd.f32 %v706_v32, %v705_v31 }
 0x14a   : > { %v508_v38 = vrot.slane %v507_v5, 4 }
 0x14b   : > { %v709_v39 = vadd.f32 %v708_v35, %v707_v34 }
 0x14c   : > { %v509_v45 = vmax.f32 %v507_v5, %v508_v38 }
 0x14d   : > { %v711_v24 = vadd.f32 %v710_v41, %v709_v39 }
 0x14e   : > { %v510_v47 = vrot.slane %v509_v45, 2 }
 0x14f   : > { %v713_v49 = vadd.f32 %v712_v46, %v711_v24 }
 0x150   : > { %v511_v50 = vmax.f32 %v509_v45, %v510_v47 }
 0x151   : > { %v715_v55 = vadd.f32 %v714_v51, %v713_v49 }
 0x152   : > { %v512_v54 = vrot.slane %v511_v50, 1 }
 0x153   : > { %v717_v28 = vadd.f32 %v716_v62, %v715_v55 }
 0x154   : > { %v513_v0 = vmax.f32 %v511_v50, %v512_v54 }
 0x155   : > { %v718_v56 = vrot.slane %v717_v28, 4 }
 0x156   : > { %v1751_v2 = vmax.f32 %v1748_v63, %v513_v0 }
 0x157   : > { %v719_v6 = vadd.f32 %v718_v56, %v717_v28 }
 0x158   : > { %v1756_v7 = vrot.slane %v1751_v2, %v523_v21  ;;  %614 = vst.msk [vmem:[#allocation2] sm:$0x1] %vm612_vm2, %v1751_v2 }
 0x159   : > { %v720_v12 = vrot.slane %v719_v6, 2 }
 0x15a   : > { %v526_v8 = vsub.f32 %v1591_v43, %v1756_v7  ;;  %v527_v9 = vsub.f32 %v1578_v36, %v1756_v7  ;;  %v528_v10 = vsub.f32 %v1616_v59, %v1756_v7  ;;  %v529_v11 = vsub.f32 %v1604_v52, %v1756_v7 }
 0x15b   : > { %v530_v20 = vsub.f32 %v1662_v14, %v1756_v7  ;;  %v531_v17 = vsub.f32 %v1637_v3, %v1756_v7  ;;  %v721_v19 = vadd.f32 %v720_v12, %v719_v6  ;;  %v532_v36 = vsub.f32 %v1692_v42, %v1756_v7 }
 0x15c   : > { %v542_v21 = vmul.f32 1.442695, %v526_v8  ;;  %v544_v16 = vmul.f32 1.442695, %v527_v9  ;;  %v546_v18 = vmul.f32 1.442695, %v528_v10  ;;  %v533_v52 = vsub.f32 %v1679_v29, %v1756_v7 }
 0x15d   : > { %v548_v43 = vmul.f32 1.442695, %v529_v11  ;;  %v550_v59 = vmul.f32 1.442695, %v530_v20  ;;  %v552_v14 = vmul.f32 1.442695, %v531_v17  ;;  %v534_v3 = vsub.f32 %v1594_v44, %v1756_v7 }
 0x15e   : > { %1080 = vpow2.f32 %v542_v21  ;;  %v722_v40 = vrot.slane %v721_v19, 1  ;;  %v554_v25 = vmul.f32 1.442695, %v532_v36  ;;  %v535_v27 = vsub.f32 %v1582_v37, %v1756_v7 }
 0x15f   : > { %1082 = vpow2.f32 %v544_v16  ;;  %v556_v42 = vmul.f32 1.442695, %v533_v52  ;;  %v536_v31 = vsub.f32 %v1619_v60, %v1756_v7  ;;  %v558_v29 = vmul.f32 1.442695, %v534_v3 }
 0x160   : > { %1084 = vpow2.f32 %v546_v18  ;;  %v723_v26 = vadd.f32 %v722_v40, %v721_v19  ;;  %v537_v32 = vsub.f32 %v1606_v53, %v1756_v7  ;;  %v560_v44 = vmul.f32 1.442695, %v535_v27 }
 0x161   : > { %1086 = vpow2.f32 %v548_v43  ;;  %v538_v5 = vsub.f32 %v1664_v15, %v1756_v7  ;;  %v562_v37 = vmul.f32 1.442695, %v536_v31  ;;  %v539_v60 = vsub.f32 %v1639_v4, %v1756_v7 }
 0x162   : > { %1088 = vpow2.f32 %v550_v59  ;;  %v724_v13 = vadd.f32 %v723_v26, %v650_v22  ;;  %v564_v38 = vmul.f32 1.442695, %v537_v32  ;;  %v540_v41 = vsub.f32 %v1703_v58, %v1756_v7 }
 0x163   : > { %1090 = vpow2.f32 %v552_v14  ;;  %v566_v15 = vmul.f32 1.442695, %v538_v5  ;;  %v541_v46 = vsub.f32 %v1681_v30, %v1756_v7  ;;  %v568_v4 = vmul.f32 1.442695, %v539_v60  ;;  %v515_v5 = vld [vmem:[#allocation3] sm:$0x1] }
 0x164   : > { %1092 = vpow2.f32 %v554_v25  ;;  %725 = vst.msk [vmem:[#allocation4] sm:$0x1] %vm612_vm2, %v724_v13  ;;  %v570_v50 = vmul.f32 1.442695, %v540_v41  ;;  %v516_v16 = vsub.f32 %v1748_v63, %v1751_v2 }
 0x165   : > { %1094 = vpow2.f32 %v556_v42  ;;  %v572_v62 = vmul.f32 1.442695, %v541_v46 }
 0x166   : > { %1096 = vpow2.f32 %v558_v29  ;;  %v517_v52 = vmul.f32 1.442695, %v516_v16 }
 0x167   : > { %1098 = vpow2.f32 %v560_v44 }
 0x168   : > { %1100 = vpow2.f32 %v562_v37 }
 0x169   : > { %1102 = vpow2.f32 %v564_v38 }
 0x16a   : > { %1104 = vpow2.f32 %v566_v15 }
 0x16b   : > { %v1081_v61 = vpop.eup %1080  ;;  %1106 = vpow2.f32 %v568_v4 }
 0x16c   : > { %v1083_v33 = vpop.eup %1082  ;;  %v574_v34 = vsel %vm476_vm3, %v1081_v61, 0.0  ;;  %1108 = vpow2.f32 %v570_v50 }
 0x16d   : > { %v1085_v35 = vpop.eup %1084  ;;  %v575_v57 = vsel %vm476_vm3, %v1083_v33, 0.0  ;;  %1110 = vpow2.f32 %v572_v62 }
 0x16e   : > { %v1087_v53 = vpop.eup %1086  ;;  %v576_v39 = vadd.f32 %v575_v57, %v574_v34  ;;  %v577_v45 = vsel %vm476_vm3, %v1085_v35, 0.0  ;;  %1112 = vpow2.f32 %v517_v52 }
 0x16f   : > { %v1089_v1 = vpop.eup %1088  ;;  %v579_v47 = vsel %vm476_vm3, %v1087_v53, 0.0 }
 0x170   : > { %v578_v24 = vadd.f32 %v577_v45, %v576_v39  ;;  %v1091_v48 = vpop.eup %1090  ;;  %v581_v51 = vsel %vm476_vm3, %v1089_v1, 0.0 }
 0x171   : > { %v1093_v58 = vpop.eup %1092  ;;  %v583_v54 = vsel %vm476_vm3, %v1091_v48, 0.0 }
 0x172   : > { %v580_v49 = vadd.f32 %v579_v47, %v578_v24  ;;  %v1095_v28 = vpop.eup %1094  ;;  %v585_v30 = vsel %vm476_vm3, %v1093_v58, 0.0 }
 0x173   : > { %v1097_v56 = vpop.eup %1096  ;;  %v587_v7 = vsel %vm476_vm3, %v1095_v28, 0.0 }
 0x174   : > { %v582_v55 = vadd.f32 %v581_v51, %v580_v49  ;;  %v1099_v8 = vpop.eup %1098  ;;  %v589_v10 = vsel %vm476_vm3, %v1097_v56, 0.0 }
 0x175   : > { %v1101_v11 = vpop.eup %1100  ;;  %v591_v20 = vsel %vm476_vm3, %v1099_v8, 0.0 }
 0x176   : > { %v584_v0 = vadd.f32 %v583_v54, %v582_v55  ;;  %v1103_v21 = vpop.eup %1102  ;;  %v593_v18 = vsel %vm476_vm3, %v1101_v11, 0.0 }
 0x177   : > { %v1105_v43 = vpop.eup %1104  ;;  %v595_v36 = vsel %vm476_vm3, %v1103_v21, 0.0 }
 0x178   : > { %v586_v6 = vadd.f32 %v585_v30, %v584_v0  ;;  %v1107_v59 = vpop.eup %1106  ;;  %v597_v40 = vsel %vm476_vm3, %v1105_v43, 0.0 }
 0x179   : > { %v1109_v22 = vpop.eup %1108  ;;  %v599_v25 = vsel %vm476_vm3, %v1107_v59, 0.0 }
 0x17a   : > { %v588_v9 = vadd.f32 %v587_v7, %v586_v6  ;;  %v1111_v26 = vpop.eup %1110  ;;  %v601_v63 = vsel %vm476_vm3, %v1109_v22, 0.0 }
 0x17b   : > { %v603_v42 = vsel %vm476_vm3, %v1111_v26, 0.0  ;;  %v1113_v61 = vpop.eup %1112 }
 0x17c   : > { %v590_v12 = vadd.f32 %v589_v10, %v588_v9  ;;  %v519_v33 = vmul.f32 %v1113_v61, %v515_v5 }
 0x17e   : > { %v592_v17 = vadd.f32 %v591_v20, %v590_v12 }
 0x180   : > { %v594_v19 = vadd.f32 %v593_v18, %v592_v17 }
 0x182   : > { %v596_v14 = vadd.f32 %v595_v36, %v594_v19 }
 0x184   : > { %v598_v3 = vadd.f32 %v597_v40, %v596_v14 }
 0x186   : > { %v600_v27 = vadd.f32 %v599_v25, %v598_v3 }
 0x188   : > { %v602_v2 = vadd.f32 %v601_v63, %v600_v27 }
 0x18a   : > { %v604_v13 = vadd.f32 %v603_v42, %v602_v2 }
 0x18c   : > { %v605_v31 = vrot.slane %v604_v13, 4 }
 0x18e   : > { %v606_v29 = vadd.f32 %v605_v31, %v604_v13 }
 0x190   : > { %v607_v32 = vrot.slane %v606_v29, 2 }
 0x192   : > { %v608_v44 = vadd.f32 %v607_v32, %v606_v29 }
 0x194   : > { %v609_v37 = vrot.slane %v608_v44, 1 }
 0x196   : > { %v610_v34 = vadd.f32 %v609_v37, %v608_v44  ;;  %729 = sbr.rel (%p916_p0) target bundleno = 646 (0x286), region = 52 }
 0x198   : > { %v611_v35 = vadd.f32 %v610_v34, %v519_v33 }
 0x19a   : > { %613 = vst.msk [vmem:[#allocation3] sm:$0x1] %vm612_vm2, %v611_v35 }
 0x19b   : > { %v730_v57 = vld [vmem:[#allocation2] sm:$0x1]  ;;  %v736_v39 = vld [vmem:[#allocation4] sm:$0x1]  ;;  %vm735_vm3 = vcmp.ne.s32.totalorder %v1558_v23, 4294967196  ;;  %v1307_v1 = vmov 0.0  }
 0x19c   : > { %v917_v24 = vsel %vm735_vm3, 1.0, %v1307_v1  ;;  %vm750_vm4 = vcmask 0  }
 0x19d   : > { %v754_v4 = vsel %vm612_vm2, %v917_v24, 0.0 }
 0x1a1   : > { %v731_v60 = vld [vmem:[#allocation3] sm:$0x1] }
 0x1a2   : > { %1114 = vlog2.f32 %v731_v60 }
 0x1af   : > { %v1115_v38 = vpop.eup %1114 }
 0x1b0   : > { %v733_v53 = vmul.f32 0.6931472, %v1115_v38 }
 0x1b2   : > { %v734_v41 = vadd.f32 %v733_v53, %v730_v57 }
 0x1b4   : > { %v737_v15 = vsub.f32 %v734_v41, %v736_v39 }
 0x1b6   : > { %v738_v45 = vsel %vm735_vm3, %v737_v15, 0.0 }
 0x1b7   : > { %v739_v46 = vsel %vm612_vm2, %v738_v45, 0.0 }
 0x1b8   : > { %740 = vadd.xlane.f32.xlu0 %v739_v46 }
 0x1bc   : > { %755 = vadd.xlane.f32.xlu0 %v754_v4 }
 0x241   : > { %v741_v47 = vpop.xlane.xlu0 %740 }
 0x242   : > { %v742_v48 = vrot.slane %v741_v47, 4 }
 0x244   : > { %v743_v49 = vadd.f32 %v742_v48, %v741_v47 }
 0x245   : > { %v756_v50 = vpop.xlane.xlu0 %755 }
 0x246   : > { %v744_v51 = vrot.slane %v743_v49, 2  ;;  %v757_v58 = vrot.slane %v756_v50, 4 }
 0x248   : > { %v758_v55 = vadd.f32 %v757_v58, %v756_v50  ;;  %v745_v23 = vadd.f32 %v744_v51, %v743_v49 }
 0x24a   : > { %v759_v62 = vrot.slane %v758_v55, 2  ;;  %v746_v54 = vrot.slane %v745_v23, 1 }
 0x24c   : > { %v760_v28 = vadd.f32 %v759_v62, %v758_v55  ;;  %v747_v0 = vadd.f32 %v746_v54, %v745_v23 }
 0x24e   : > { %966 = vpush %v747_v0  ;;  %v761_v30 = vrot.slane %v760_v28, 1 }
 0x250   : > { %v762_v56 = vadd.f32 %v761_v30, %v760_v28 }
 0x252   : > { %968 = vpush %v762_v56 }
 0x27f   : > { %s967_s11 = spop %966 }
 0x280   : > { %v749_v6 = vstv %s967_s11 }
 0x281   : > { %751 = vst.msk [vmem:[%s300_s21] sm:$0x1] %vm750_vm4, %v749_v6 }
 0x283   : > { %s969_s28 = spop %968 }
 0x284   : > { %v764_v7 = vstv %s969_s28 }
 0x285   : > { %765 = vst.msk [vmem:[%s303_s9] sm:$0x1] %vm750_vm4, %v764_v7 }
 0x286 PF: > { %s21_s25 = sadd.s32 1, %s1298_s25   ;;  %s1887_s27 = sld [smem:[#allocation17_spill]] }
 0x287   : > { %p18_p4 = scmp.ge.s32.totalorder %s21_s25, 10   ;;  %s1888_s8 = sld [smem:[#allocation13_spill]] }
 0x288   : > { %s1889_s20 = sld [smem:[#allocation18_spill]]  ;;  %s1892_s15 = smov %s1262_s16 }
 0x289   : > { %s1890_s29 = sld [smem:[#allocation15_spill]]  ;;  %s1893_s16 = smov %s1266_s17 }
 0x28a   : > { %s1891_s30 = sld [smem:[#allocation16_spill]]  ;;  %s1895_s18 = smov %s1274_s19 }
 0x28b   : > { %s1897_s21 = smov %s1290_s23  ;;  %s1898_s22 = smov %s1294_s24 }
 0x28c   : > { %s1894_s17 = smov %s1887_s27  ;;  %20 = sbr.rel (!%p18_p4) target bundleno = 11 (0xb), region = 116 }
 0x28d   : > { %s1896_s19 = smov %s1888_s8 }
 0x28f   : > { %s1899_s23 = smov %s1890_s29 }
 0x290   : > { %s1900_s24 = smov %s1891_s30 }
 0x291   :  { %795 = vsyncpa [#allocation6], 1 }
 0x292   :  { %797 = vsyncpa [#allocation6 + $0x1], 1 }
 0x293   :  { %798 = vsyncpa [#allocation8], 1 }
 0x294   :  { %800 = vsyncpa [#allocation8 + $0x1], 1 }

</bundles_post_ra>
